<compile_context>
chip_gen: v7x
topology: tpu7x:2x2x1
jax: 0.10.0
libtpu: 0.0.40
codegen_flags: <defaults>
</compile_context>

<pallas_src>
import functools
import math

import jax
import jax.numpy as jnp
from jax.experimental import pallas as pl
from jax.experimental.pallas import tpu as pltpu


def _layernorm(v, w, b, eps=1e-5):
    # f32 statistics for numerical parity with PyTorch LayerNorm.
    mu = jnp.mean(v, axis=-1, keepdims=True)
    var = jnp.mean((v - mu) ** 2, axis=-1, keepdims=True)
    return (v - mu) * jax.lax.rsqrt(var + eps) * w + b


def encoder_layer_kernel(num_heads,
                         bias_ref, x_ref,
                         wqkv_ref, bqkv_ref, wo_ref, bo_ref,
                         ln1w_ref, ln1b_ref, ln2w_ref, ln2b_ref,
                         w1_ref, b1_ref, w2_ref, b2_ref,
                         out_ref,
                         ctx_ref):
    x = x_ref[0].astype(jnp.float32)        # (S, D) residual stream, f32
    key_bias = bias_ref[0]                  # (1, S) additive bias: 0 / -1e9
    S, D = x.shape
    dh = D // num_heads
    scale = 1.0 / math.sqrt(dh)

    # ---- sublayer 1: multi-head self-attention on norm1(x) ----
    xn = _layernorm(x, ln1w_ref[0], ln1b_ref[0]).astype(jnp.bfloat16)

    # Fused QKV projection: one wide bf16 matmul, f32 accumulation.
    qkv = jnp.dot(xn, wqkv_ref[...],
                  preferred_element_type=jnp.float32) + bqkv_ref[0]   # (S, 3D)
    q = qkv[:, :D] * scale            # scale folded into q (S*D mults)
    k = qkv[:, D:2 * D]
    v = qkv[:, 2 * D:]

    # Per-head attention; each head's context is written straight into the
    # (S, D) VMEM scratch slab (no concatenate materialized).
    for h in range(num_heads):
        sl = slice(h * dh, (h + 1) * dh)
        qh = q[:, sl].astype(jnp.bfloat16)
        kh = k[:, sl].astype(jnp.bfloat16)
        vh = v[:, sl].astype(jnp.bfloat16)

        s = jnp.dot(qh, kh.T, preferred_element_type=jnp.float32)     # (S, S)
        s = s + key_bias                     # hoisted mask -> broadcast add
        m = jnp.max(s, axis=-1, keepdims=True)
        e = jnp.exp(s - m)
        p = e * pl.reciprocal(jnp.sum(e, axis=-1, keepdims=True), approx=True)
        ctx_ref[:, sl] = jnp.dot(p.astype(jnp.bfloat16), vh,
                                 preferred_element_type=jnp.float32)

    attn = jnp.dot(ctx_ref[...].astype(jnp.bfloat16), wo_ref[...],
                   preferred_element_type=jnp.float32) + bo_ref[0]

    x = x + attn                             # dropout == identity (eval)

    # ---- sublayer 2: feed-forward on norm2(x) ----
    xn2 = _layernorm(x, ln2w_ref[0], ln2b_ref[0]).astype(jnp.bfloat16)
    hdn = jnp.dot(xn2, w1_ref[...],
                  preferred_element_type=jnp.float32) + b1_ref[0]
    hdn = jnp.maximum(hdn, 0.0).astype(jnp.bfloat16)
    ffn = jnp.dot(hdn, w2_ref[...],
                  preferred_element_type=jnp.float32) + b2_ref[0]

    out_ref[0] = (x + ffn).astype(out_ref.dtype)


def encoder_layer(x, mask, params, num_heads):
    B, S, D = x.shape

    # Compact additive key-padding bias (B, 1, S): 0 where attended, -1e9 where
    # masked.  Accepts either a (B, S) key-validity mask or the module's
    # (B, 1, S, S) / (B, 1, 1, S) padding mask.
    # TODO(synk): general per-query masks (e.g. causal) would need (S, S) bias
    #   tiles instead of a single key row.
    if mask.ndim == 4:
        key_valid = mask[:, 0, 0, :]
    else:
        key_valid = mask
    key_bias = jnp.where(key_valid > 0, 0.0, -1e9).astype(jnp.float32)
    key_bias = key_bias.reshape(B, 1, S)

    param_list = [
        params["wqkv"], params["bqkv"], params["wo"], params["bo"],
        params["ln1_w"], params["ln1_b"], params["ln2_w"], params["ln2_b"],
        params["w1"], params["b1"], params["w2"], params["b2"],
    ]

    def const_spec(arr):
        # Constant across the grid -> fetched once; single-buffer to halve the
        # VMEM footprint of weights/biases.
        nd = arr.ndim
        return pl.BlockSpec(arr.shape, lambda b, _nd=nd: (0,) * _nd,
                            pipeline_mode=pl.Buffered(1))

    in_specs = [
        pl.BlockSpec((1, 1, S), lambda b: (b, 0, 0)),   # key-padding bias
        pl.BlockSpec((1, S, D), lambda b: (b, 0, 0)),   # x
    ] + [const_spec(p) for p in param_list]

    kernel = functools.partial(encoder_layer_kernel, num_heads)

    return pl.pallas_call(
        kernel,
        out_shape=jax.ShapeDtypeStruct((B, S, D), x.dtype),
        grid=(B,),
        in_specs=in_specs,
        out_specs=pl.BlockSpec((1, S, D), lambda b: (b, 0, 0)),
        scratch_shapes=[pltpu.VMEM((S, D), jnp.float32)],   # head-context slab
        compiler_params=pltpu.CompilerParams(
            dimension_semantics=("parallel",)),
    )(key_bias, x, *param_list)


def init_params(key, d_model, num_heads, d_ff):
    ks = jax.random.split(key, 6)

    def lin(k, din, dout):
        bound = 1.0 / math.sqrt(din)
        return jax.random.uniform(k, (din, dout), jnp.float32, -bound, bound)

    wq = lin(ks[0], d_model, d_model)
    wk = lin(ks[1], d_model, d_model)
    wv = lin(ks[2], d_model, d_model)

    params = {
        # Matmul weights stored bf16 (MXU operand dtype); biases / LN params f32.
        "wqkv": jnp.concatenate([wq, wk, wv], axis=1).astype(jnp.bfloat16),
        "bqkv": jnp.zeros((1, 3 * d_model), jnp.float32),
        "wo": lin(ks[3], d_model, d_model).astype(jnp.bfloat16),
        "bo": jnp.zeros((1, d_model), jnp.float32),
        "ln1_w": jnp.ones((1, d_model), jnp.float32),
        "ln1_b": jnp.zeros((1, d_model), jnp.float32),
        "ln2_w": jnp.ones((1, d_model), jnp.float32),
        "ln2_b": jnp.zeros((1, d_model), jnp.float32),
        "w1": lin(ks[4], d_model, d_ff).astype(jnp.bfloat16),
        "b1": jnp.zeros((1, d_ff), jnp.float32),
        "w2": lin(ks[5], d_ff, d_model).astype(jnp.bfloat16),
        "b2": jnp.zeros((1, d_model), jnp.float32),
    }
    return params


if __name__ == "__main__":
    # NOTE: toy shapes; real deployments should keep D, d_ff multiples of 128
    # and dh = 128 so stores stay lane-dense and per-head matmuls fill the MXU.
    B, S, d_model, num_heads, d_ff = 2, 8, 32, 4, 64

    key = jax.random.PRNGKey(0)
    k_x, k_p = jax.random.split(key)

    x = jax.random.normal(k_x, (B, S, d_model), jnp.float32)

    # padding mask: batch 0 attends to everything; batch 1 masks the last 2 keys
    key_valid = jnp.array(
        [[1] * S, [1] * (S - 2) + [0] * 2], dtype=jnp.float32)        # (B, S)
    mask = jnp.broadcast_to(key_valid[:, None, None, :], (B, 1, S, S))

    params = init_params(k_p, d_model, num_heads, d_ff)

    out = encoder_layer(x, mask, params, num_heads)
    jax.block_until_ready(out)
    assert out.shape == (B, S, d_model)
    assert bool(jnp.all(jnp.isfinite(out)))
    print("KERNEL_OK")
</pallas_src>

<mosaic_0001>
module attributes {stable_mosaic.version = 11 : i64} {
  func.func @encoder_layer_kernel(%arg0: i32, %arg1: memref<1x1x8xf32, #tpu.memory_space<vmem>>, %arg2: memref<1x8x32xf32, #tpu.memory_space<vmem>>, %arg3: memref<32x96xbf16, #tpu.memory_space<vmem>>, %arg4: memref<1x96xf32, #tpu.memory_space<vmem>>, %arg5: memref<32x32xbf16, #tpu.memory_space<vmem>>, %arg6: memref<1x32xf32, #tpu.memory_space<vmem>>, %arg7: memref<1x32xf32, #tpu.memory_space<vmem>>, %arg8: memref<1x32xf32, #tpu.memory_space<vmem>>, %arg9: memref<1x32xf32, #tpu.memory_space<vmem>>, %arg10: memref<1x32xf32, #tpu.memory_space<vmem>>, %arg11: memref<32x64xbf16, #tpu.memory_space<vmem>>, %arg12: memref<1x64xf32, #tpu.memory_space<vmem>>, %arg13: memref<64x32xbf16, #tpu.memory_space<vmem>>, %arg14: memref<1x32xf32, #tpu.memory_space<vmem>>, %arg15: memref<1x8x32xf32, #tpu.memory_space<vmem>>, %arg16: memref<8x32xf32, #tpu.memory_space<vmem>>) attributes {dimension_semantics = [#tpu.dimension_semantics<parallel>], iteration_bounds = array<i64: 2>, scalar_prefetch = 0 : i64, scratch_operands = 1 : i64, tpu.core_type = #tpu.core_type<tc>, window_params = [{transform_indices = @transform_0, window_bounds = array<i64: 1, 1, 8>}, {transform_indices = @transform_1, window_bounds = array<i64: 1, 8, 32>}, {pipeline_mode = #tpu.pipeline_mode<synchronous>, transform_indices = @transform_2, window_bounds = array<i64: 32, 96>}, {pipeline_mode = #tpu.pipeline_mode<synchronous>, transform_indices = @transform_3, window_bounds = array<i64: 1, 96>}, {pipeline_mode = #tpu.pipeline_mode<synchronous>, transform_indices = @transform_4, window_bounds = array<i64: 32, 32>}, {pipeline_mode = #tpu.pipeline_mode<synchronous>, transform_indices = @transform_5, window_bounds = array<i64: 1, 32>}, {pipeline_mode = #tpu.pipeline_mode<synchronous>, transform_indices = @transform_6, window_bounds = array<i64: 1, 32>}, {pipeline_mode = #tpu.pipeline_mode<synchronous>, transform_indices = @transform_7, window_bounds = array<i64: 1, 32>}, {pipeline_mode = #tpu.pipeline_mode<synchronous>, transform_indices = @transform_8, window_bounds = array<i64: 1, 32>}, {pipeline_mode = #tpu.pipeline_mode<synchronous>, transform_indices = @transform_9, window_bounds = array<i64: 1, 32>}, {pipeline_mode = #tpu.pipeline_mode<synchronous>, transform_indices = @transform_10, window_bounds = array<i64: 32, 64>}, {pipeline_mode = #tpu.pipeline_mode<synchronous>, transform_indices = @transform_11, window_bounds = array<i64: 1, 64>}, {pipeline_mode = #tpu.pipeline_mode<synchronous>, transform_indices = @transform_12, window_bounds = array<i64: 64, 32>}, {pipeline_mode = #tpu.pipeline_mode<synchronous>, transform_indices = @transform_13, window_bounds = array<i64: 1, 32>}, {transform_indices = @transform_14, window_bounds = array<i64: 1, 8, 32>}]} {
    %c0 = arith.constant 0 : index
    %c0_0 = arith.constant 0 : index
    %c0_1 = arith.constant 0 : index
    %0 = vector.load %arg2[%c0, %c0_0, %c0_1] : memref<1x8x32xf32, #tpu.memory_space<vmem>>, vector<1x8x32xf32>
    %1 = vector.shape_cast %0 : vector<1x8x32xf32> to vector<8x32xf32>
    %c0_2 = arith.constant 0 : index
    %c0_3 = arith.constant 0 : index
    %c0_4 = arith.constant 0 : index
    %2 = vector.load %arg1[%c0_2, %c0_3, %c0_4] : memref<1x1x8xf32, #tpu.memory_space<vmem>>, vector<1x1x8xf32>
    %3 = vector.shape_cast %2 : vector<1x1x8xf32> to vector<1x8xf32>
    %c0_5 = arith.constant 0 : index
    %c0_6 = arith.constant 0 : index
    %4 = vector.load %arg7[%c0_5, %c0_6] : memref<1x32xf32, #tpu.memory_space<vmem>>, vector<1x32xf32>
    %5 = vector.shape_cast %4 : vector<1x32xf32> to vector<32xf32>
    %c0_7 = arith.constant 0 : index
    %c0_8 = arith.constant 0 : index
    %6 = vector.load %arg8[%c0_7, %c0_8] : memref<1x32xf32, #tpu.memory_space<vmem>>, vector<1x32xf32>
    %7 = vector.shape_cast %6 : vector<1x32xf32> to vector<32xf32>
    %cst = arith.constant dense<0.000000e+00> : vector<8xf32>
    %8 = vector.multi_reduction <add>, %1, %cst [1] : vector<8x32xf32> to vector<8xf32>
    %9 = vector.shape_cast %8 : vector<8xf32> to vector<8x1xf32>
    %cst_9 = arith.constant 3.200000e+01 : f32
    %10 = vector.broadcast %cst_9 : f32 to vector<8x1xf32>
    %11 = arith.divf %9, %10 : vector<8x1xf32>
    %12 = vector.broadcast %11 : vector<8x1xf32> to vector<8x32xf32>
    %13 = arith.subf %1, %12 : vector<8x32xf32>
    %14 = arith.mulf %13, %13 : vector<8x32xf32>
    %cst_10 = arith.constant dense<0.000000e+00> : vector<8xf32>
    %15 = vector.multi_reduction <add>, %14, %cst_10 [1] : vector<8x32xf32> to vector<8xf32>
    %16 = vector.shape_cast %15 : vector<8xf32> to vector<8x1xf32>
    %cst_11 = arith.constant 3.200000e+01 : f32
    %17 = vector.broadcast %cst_11 : f32 to vector<8x1xf32>
    %18 = arith.divf %16, %17 : vector<8x1xf32>
    %19 = vector.broadcast %11 : vector<8x1xf32> to vector<8x32xf32>
    %20 = arith.subf %1, %19 : vector<8x32xf32>
    %cst_12 = arith.constant 9.99999974E-6 : f32
    %21 = vector.broadcast %cst_12 : f32 to vector<8x1xf32>
    %22 = arith.addf %18, %21 : vector<8x1xf32>
    %23 = math.rsqrt %22 : vector<8x1xf32>
    %24 = vector.broadcast %23 : vector<8x1xf32> to vector<8x32xf32>
    %25 = arith.mulf %20, %24 : vector<8x32xf32>
    %26 = vector.shape_cast %5 : vector<32xf32> to vector<1x32xf32>
    %27 = vector.broadcast %26 : vector<1x32xf32> to vector<8x32xf32>
    %28 = arith.mulf %25, %27 : vector<8x32xf32>
    %29 = vector.shape_cast %7 : vector<32xf32> to vector<1x32xf32>
    %30 = vector.broadcast %29 : vector<1x32xf32> to vector<8x32xf32>
    %31 = arith.addf %28, %30 : vector<8x32xf32>
    %32 = arith.truncf %31 : vector<8x32xf32> to vector<8x32xbf16>
    %c0_13 = arith.constant 0 : index
    %c0_14 = arith.constant 0 : index
    %33 = vector.load %arg3[%c0_13, %c0_14] : memref<32x96xbf16, #tpu.memory_space<vmem>>, vector<32x96xbf16>
    %cst_15 = arith.constant dense<0.000000e+00> : vector<8x96xf32>
    %34 = tpu.matmul %32, %33, %cst_15 {dimension_numbers = #tpu.dot_dimension_numbers<[1], [0], [0], [1], [0, 0, 1, 1], [], []>} : vector<8x32xbf16>, vector<32x96xbf16>, vector<8x96xf32> -> vector<8x96xf32>
    %c0_16 = arith.constant 0 : index
    %c0_17 = arith.constant 0 : index
    %35 = vector.load %arg4[%c0_16, %c0_17] : memref<1x96xf32, #tpu.memory_space<vmem>>, vector<1x96xf32>
    %36 = vector.shape_cast %35 : vector<1x96xf32> to vector<96xf32>
    %37 = vector.shape_cast %36 : vector<96xf32> to vector<1x96xf32>
    %38 = vector.broadcast %37 : vector<1x96xf32> to vector<8x96xf32>
    %39 = arith.addf %34, %38 : vector<8x96xf32>
    %40 = vector.extract_strided_slice %39 {offsets = [0, 0], sizes = [8, 32], strides = [1, 1]} : vector<8x96xf32> to vector<8x32xf32>
    %cst_18 = arith.constant 0.353553385 : f32
    %41 = vector.broadcast %cst_18 : f32 to vector<8x32xf32>
    %42 = arith.mulf %40, %41 : vector<8x32xf32>
    %43 = vector.extract_strided_slice %39 {offsets = [0, 32], sizes = [8, 32], strides = [1, 1]} : vector<8x96xf32> to vector<8x32xf32>
    %44 = vector.extract_strided_slice %39 {offsets = [0, 64], sizes = [8, 32], strides = [1, 1]} : vector<8x96xf32> to vector<8x32xf32>
    %45 = vector.extract_strided_slice %42 {offsets = [0, 0], sizes = [8, 8], strides = [1, 1]} : vector<8x32xf32> to vector<8x8xf32>
    %46 = arith.truncf %45 : vector<8x8xf32> to vector<8x8xbf16>
    %47 = vector.extract_strided_slice %43 {offsets = [0, 0], sizes = [8, 8], strides = [1, 1]} : vector<8x32xf32> to vector<8x8xf32>
    %48 = arith.truncf %47 : vector<8x8xf32> to vector<8x8xbf16>
    %49 = vector.extract_strided_slice %44 {offsets = [0, 0], sizes = [8, 8], strides = [1, 1]} : vector<8x32xf32> to vector<8x8xf32>
    %50 = arith.truncf %49 : vector<8x8xf32> to vector<8x8xbf16>
    %51 = tpu.transpose %48, [1, 0] : vector<8x8xbf16> -> vector<8x8xbf16>
    %cst_19 = arith.constant dense<0.000000e+00> : vector<8x8xf32>
    %52 = tpu.matmul %46, %51, %cst_19 {dimension_numbers = #tpu.dot_dimension_numbers<[1], [0], [0], [1], [0, 0, 1, 1], [], []>} : vector<8x8xbf16>, vector<8x8xbf16>, vector<8x8xf32> -> vector<8x8xf32>
    %53 = vector.broadcast %3 : vector<1x8xf32> to vector<8x8xf32>
    %54 = arith.addf %52, %53 : vector<8x8xf32>
    %cst_20 = arith.constant dense<0xFF800000> : vector<8xf32>
    %55 = vector.multi_reduction <maximumf>, %54, %cst_20 [1] : vector<8x8xf32> to vector<8xf32>
    %56 = vector.shape_cast %55 : vector<8xf32> to vector<8x1xf32>
    %57 = vector.broadcast %56 : vector<8x1xf32> to vector<8x8xf32>
    %58 = arith.subf %54, %57 : vector<8x8xf32>
    %59 = math.exp %58 : vector<8x8xf32>
    %cst_21 = arith.constant dense<0.000000e+00> : vector<8xf32>
    %60 = vector.multi_reduction <add>, %59, %cst_21 [1] : vector<8x8xf32> to vector<8xf32>
    %61 = vector.shape_cast %60 : vector<8xf32> to vector<8x1xf32>
    %62 = tpu.reciprocal %61 {approx = true} : vector<8x1xf32> -> vector<8x1xf32>
    %63 = vector.broadcast %62 : vector<8x1xf32> to vector<8x8xf32>
    %64 = arith.mulf %59, %63 : vector<8x8xf32>
    %65 = arith.truncf %64 : vector<8x8xf32> to vector<8x8xbf16>
    %cst_22 = arith.constant dense<0.000000e+00> : vector<8x8xf32>
    %66 = tpu.matmul %65, %50, %cst_22 {dimension_numbers = #tpu.dot_dimension_numbers<[1], [0], [0], [1], [0, 0, 1, 1], [], []>} : vector<8x8xbf16>, vector<8x8xbf16>, vector<8x8xf32> -> vector<8x8xf32>
    %c0_23 = arith.constant 0 : index
    %c0_24 = arith.constant 0 : index
    %67 = vector.load %arg16[%c0_23, %c0_24] : memref<8x32xf32, #tpu.memory_space<vmem>>, vector<8x8xf32>
    tpu.vector_store %arg16[%c0_23, %c0_24], %66 {strides = array<i32>} : memref<8x32xf32, #tpu.memory_space<vmem>>, vector<8x8xf32>,
    %68 = vector.extract_strided_slice %42 {offsets = [0, 8], sizes = [8, 8], strides = [1, 1]} : vector<8x32xf32> to vector<8x8xf32>
    %69 = arith.truncf %68 : vector<8x8xf32> to vector<8x8xbf16>
    %70 = vector.extract_strided_slice %43 {offsets = [0, 8], sizes = [8, 8], strides = [1, 1]} : vector<8x32xf32> to vector<8x8xf32>
    %71 = arith.truncf %70 : vector<8x8xf32> to vector<8x8xbf16>
    %72 = vector.extract_strided_slice %44 {offsets = [0, 8], sizes = [8, 8], strides = [1, 1]} : vector<8x32xf32> to vector<8x8xf32>
    %73 = arith.truncf %72 : vector<8x8xf32> to vector<8x8xbf16>
    %74 = tpu.transpose %71, [1, 0] : vector<8x8xbf16> -> vector<8x8xbf16>
    %cst_25 = arith.constant dense<0.000000e+00> : vector<8x8xf32>
    %75 = tpu.matmul %69, %74, %cst_25 {dimension_numbers = #tpu.dot_dimension_numbers<[1], [0], [0], [1], [0, 0, 1, 1], [], []>} : vector<8x8xbf16>, vector<8x8xbf16>, vector<8x8xf32> -> vector<8x8xf32>
    %76 = vector.broadcast %3 : vector<1x8xf32> to vector<8x8xf32>
    %77 = arith.addf %75, %76 : vector<8x8xf32>
    %cst_26 = arith.constant dense<0xFF800000> : vector<8xf32>
    %78 = vector.multi_reduction <maximumf>, %77, %cst_26 [1] : vector<8x8xf32> to vector<8xf32>
    %79 = vector.shape_cast %78 : vector<8xf32> to vector<8x1xf32>
    %80 = vector.broadcast %79 : vector<8x1xf32> to vector<8x8xf32>
    %81 = arith.subf %77, %80 : vector<8x8xf32>
    %82 = math.exp %81 : vector<8x8xf32>
    %cst_27 = arith.constant dense<0.000000e+00> : vector<8xf32>
    %83 = vector.multi_reduction <add>, %82, %cst_27 [1] : vector<8x8xf32> to vector<8xf32>
    %84 = vector.shape_cast %83 : vector<8xf32> to vector<8x1xf32>
    %85 = tpu.reciprocal %84 {approx = true} : vector<8x1xf32> -> vector<8x1xf32>
    %86 = vector.broadcast %85 : vector<8x1xf32> to vector<8x8xf32>
    %87 = arith.mulf %82, %86 : vector<8x8xf32>
    %88 = arith.truncf %87 : vector<8x8xf32> to vector<8x8xbf16>
    %cst_28 = arith.constant dense<0.000000e+00> : vector<8x8xf32>
    %89 = tpu.matmul %88, %73, %cst_28 {dimension_numbers = #tpu.dot_dimension_numbers<[1], [0], [0], [1], [0, 0, 1, 1], [], []>} : vector<8x8xbf16>, vector<8x8xbf16>, vector<8x8xf32> -> vector<8x8xf32>
    %c0_29 = arith.constant 0 : index
    %c8 = arith.constant 8 : index
    %90 = vector.load %arg16[%c0_29, %c8] : memref<8x32xf32, #tpu.memory_space<vmem>>, vector<8x8xf32>
    tpu.vector_store %arg16[%c0_29, %c8], %89 {strides = array<i32>} : memref<8x32xf32, #tpu.memory_space<vmem>>, vector<8x8xf32>,
    %91 = vector.extract_strided_slice %42 {offsets = [0, 16], sizes = [8, 8], strides = [1, 1]} : vector<8x32xf32> to vector<8x8xf32>
    %92 = arith.truncf %91 : vector<8x8xf32> to vector<8x8xbf16>
    %93 = vector.extract_strided_slice %43 {offsets = [0, 16], sizes = [8, 8], strides = [1, 1]} : vector<8x32xf32> to vector<8x8xf32>
    %94 = arith.truncf %93 : vector<8x8xf32> to vector<8x8xbf16>
    %95 = vector.extract_strided_slice %44 {offsets = [0, 16], sizes = [8, 8], strides = [1, 1]} : vector<8x32xf32> to vector<8x8xf32>
    %96 = arith.truncf %95 : vector<8x8xf32> to vector<8x8xbf16>
    %97 = tpu.transpose %94, [1, 0] : vector<8x8xbf16> -> vector<8x8xbf16>
    %cst_30 = arith.constant dense<0.000000e+00> : vector<8x8xf32>
    %98 = tpu.matmul %92, %97, %cst_30 {dimension_numbers = #tpu.dot_dimension_numbers<[1], [0], [0], [1], [0, 0, 1, 1], [], []>} : vector<8x8xbf16>, vector<8x8xbf16>, vector<8x8xf32> -> vector<8x8xf32>
    %99 = vector.broadcast %3 : vector<1x8xf32> to vector<8x8xf32>
    %100 = arith.addf %98, %99 : vector<8x8xf32>
    %cst_31 = arith.constant dense<0xFF800000> : vector<8xf32>
    %101 = vector.multi_reduction <maximumf>, %100, %cst_31 [1] : vector<8x8xf32> to vector<8xf32>
    %102 = vector.shape_cast %101 : vector<8xf32> to vector<8x1xf32>
    %103 = vector.broadcast %102 : vector<8x1xf32> to vector<8x8xf32>
    %104 = arith.subf %100, %103 : vector<8x8xf32>
    %105 = math.exp %104 : vector<8x8xf32>
    %cst_32 = arith.constant dense<0.000000e+00> : vector<8xf32>
    %106 = vector.multi_reduction <add>, %105, %cst_32 [1] : vector<8x8xf32> to vector<8xf32>
    %107 = vector.shape_cast %106 : vector<8xf32> to vector<8x1xf32>
    %108 = tpu.reciprocal %107 {approx = true} : vector<8x1xf32> -> vector<8x1xf32>
    %109 = vector.broadcast %108 : vector<8x1xf32> to vector<8x8xf32>
    %110 = arith.mulf %105, %109 : vector<8x8xf32>
    %111 = arith.truncf %110 : vector<8x8xf32> to vector<8x8xbf16>
    %cst_33 = arith.constant dense<0.000000e+00> : vector<8x8xf32>
    %112 = tpu.matmul %111, %96, %cst_33 {dimension_numbers = #tpu.dot_dimension_numbers<[1], [0], [0], [1], [0, 0, 1, 1], [], []>} : vector<8x8xbf16>, vector<8x8xbf16>, vector<8x8xf32> -> vector<8x8xf32>
    %c0_34 = arith.constant 0 : index
    %c16 = arith.constant 16 : index
    %113 = vector.load %arg16[%c0_34, %c16] : memref<8x32xf32, #tpu.memory_space<vmem>>, vector<8x8xf32>
    tpu.vector_store %arg16[%c0_34, %c16], %112 {strides = array<i32>} : memref<8x32xf32, #tpu.memory_space<vmem>>, vector<8x8xf32>,
    %114 = vector.extract_strided_slice %42 {offsets = [0, 24], sizes = [8, 8], strides = [1, 1]} : vector<8x32xf32> to vector<8x8xf32>
    %115 = arith.truncf %114 : vector<8x8xf32> to vector<8x8xbf16>
    %116 = vector.extract_strided_slice %43 {offsets = [0, 24], sizes = [8, 8], strides = [1, 1]} : vector<8x32xf32> to vector<8x8xf32>
    %117 = arith.truncf %116 : vector<8x8xf32> to vector<8x8xbf16>
    %118 = vector.extract_strided_slice %44 {offsets = [0, 24], sizes = [8, 8], strides = [1, 1]} : vector<8x32xf32> to vector<8x8xf32>
    %119 = arith.truncf %118 : vector<8x8xf32> to vector<8x8xbf16>
    %120 = tpu.transpose %117, [1, 0] : vector<8x8xbf16> -> vector<8x8xbf16>
    %cst_35 = arith.constant dense<0.000000e+00> : vector<8x8xf32>
    %121 = tpu.matmul %115, %120, %cst_35 {dimension_numbers = #tpu.dot_dimension_numbers<[1], [0], [0], [1], [0, 0, 1, 1], [], []>} : vector<8x8xbf16>, vector<8x8xbf16>, vector<8x8xf32> -> vector<8x8xf32>
    %122 = vector.broadcast %3 : vector<1x8xf32> to vector<8x8xf32>
    %123 = arith.addf %121, %122 : vector<8x8xf32>
    %cst_36 = arith.constant dense<0xFF800000> : vector<8xf32>
    %124 = vector.multi_reduction <maximumf>, %123, %cst_36 [1] : vector<8x8xf32> to vector<8xf32>
    %125 = vector.shape_cast %124 : vector<8xf32> to vector<8x1xf32>
    %126 = vector.broadcast %125 : vector<8x1xf32> to vector<8x8xf32>
    %127 = arith.subf %123, %126 : vector<8x8xf32>
    %128 = math.exp %127 : vector<8x8xf32>
    %cst_37 = arith.constant dense<0.000000e+00> : vector<8xf32>
    %129 = vector.multi_reduction <add>, %128, %cst_37 [1] : vector<8x8xf32> to vector<8xf32>
    %130 = vector.shape_cast %129 : vector<8xf32> to vector<8x1xf32>
    %131 = tpu.reciprocal %130 {approx = true} : vector<8x1xf32> -> vector<8x1xf32>
    %132 = vector.broadcast %131 : vector<8x1xf32> to vector<8x8xf32>
    %133 = arith.mulf %128, %132 : vector<8x8xf32>
    %134 = arith.truncf %133 : vector<8x8xf32> to vector<8x8xbf16>
    %cst_38 = arith.constant dense<0.000000e+00> : vector<8x8xf32>
    %135 = tpu.matmul %134, %119, %cst_38 {dimension_numbers = #tpu.dot_dimension_numbers<[1], [0], [0], [1], [0, 0, 1, 1], [], []>} : vector<8x8xbf16>, vector<8x8xbf16>, vector<8x8xf32> -> vector<8x8xf32>
    %c0_39 = arith.constant 0 : index
    %c24 = arith.constant 24 : index
    %136 = vector.load %arg16[%c0_39, %c24] : memref<8x32xf32, #tpu.memory_space<vmem>>, vector<8x8xf32>
    tpu.vector_store %arg16[%c0_39, %c24], %135 {strides = array<i32>} : memref<8x32xf32, #tpu.memory_space<vmem>>, vector<8x8xf32>,
    %c0_40 = arith.constant 0 : index
    %c0_41 = arith.constant 0 : index
    %137 = vector.load %arg16[%c0_40, %c0_41] : memref<8x32xf32, #tpu.memory_space<vmem>>, vector<8x32xf32>
    %138 = arith.truncf %137 : vector<8x32xf32> to vector<8x32xbf16>
    %c0_42 = arith.constant 0 : index
    %c0_43 = arith.constant 0 : index
    %139 = vector.load %arg5[%c0_42, %c0_43] : memref<32x32xbf16, #tpu.memory_space<vmem>>, vector<32x32xbf16>
    %cst_44 = arith.constant dense<0.000000e+00> : vector<8x32xf32>
    %140 = tpu.matmul %138, %139, %cst_44 {dimension_numbers = #tpu.dot_dimension_numbers<[1], [0], [0], [1], [0, 0, 1, 1], [], []>} : vector<8x32xbf16>, vector<32x32xbf16>, vector<8x32xf32> -> vector<8x32xf32>
    %c0_45 = arith.constant 0 : index
    %c0_46 = arith.constant 0 : index
    %141 = vector.load %arg6[%c0_45, %c0_46] : memref<1x32xf32, #tpu.memory_space<vmem>>, vector<1x32xf32>
    %142 = vector.shape_cast %141 : vector<1x32xf32> to vector<32xf32>
    %143 = vector.shape_cast %142 : vector<32xf32> to vector<1x32xf32>
    %144 = vector.broadcast %143 : vector<1x32xf32> to vector<8x32xf32>
    %145 = arith.addf %140, %144 : vector<8x32xf32>
    %146 = arith.addf %1, %145 : vector<8x32xf32>
    %c0_47 = arith.constant 0 : index
    %c0_48 = arith.constant 0 : index
    %147 = vector.load %arg9[%c0_47, %c0_48] : memref<1x32xf32, #tpu.memory_space<vmem>>, vector<1x32xf32>
    %148 = vector.shape_cast %147 : vector<1x32xf32> to vector<32xf32>
    %c0_49 = arith.constant 0 : index
    %c0_50 = arith.constant 0 : index
    %149 = vector.load %arg10[%c0_49, %c0_50] : memref<1x32xf32, #tpu.memory_space<vmem>>, vector<1x32xf32>
    %150 = vector.shape_cast %149 : vector<1x32xf32> to vector<32xf32>
    %cst_51 = arith.constant dense<0.000000e+00> : vector<8xf32>
    %151 = vector.multi_reduction <add>, %146, %cst_51 [1] : vector<8x32xf32> to vector<8xf32>
    %152 = vector.shape_cast %151 : vector<8xf32> to vector<8x1xf32>
    %cst_52 = arith.constant 3.200000e+01 : f32
    %153 = vector.broadcast %cst_52 : f32 to vector<8x1xf32>
    %154 = arith.divf %152, %153 : vector<8x1xf32>
    %155 = vector.broadcast %154 : vector<8x1xf32> to vector<8x32xf32>
    %156 = arith.subf %146, %155 : vector<8x32xf32>
    %157 = arith.mulf %156, %156 : vector<8x32xf32>
    %cst_53 = arith.constant dense<0.000000e+00> : vector<8xf32>
    %158 = vector.multi_reduction <add>, %157, %cst_53 [1] : vector<8x32xf32> to vector<8xf32>
    %159 = vector.shape_cast %158 : vector<8xf32> to vector<8x1xf32>
    %cst_54 = arith.constant 3.200000e+01 : f32
    %160 = vector.broadcast %cst_54 : f32 to vector<8x1xf32>
    %161 = arith.divf %159, %160 : vector<8x1xf32>
    %162 = vector.broadcast %154 : vector<8x1xf32> to vector<8x32xf32>
    %163 = arith.subf %146, %162 : vector<8x32xf32>
    %cst_55 = arith.constant 9.99999974E-6 : f32
    %164 = vector.broadcast %cst_55 : f32 to vector<8x1xf32>
    %165 = arith.addf %161, %164 : vector<8x1xf32>
    %166 = math.rsqrt %165 : vector<8x1xf32>
    %167 = vector.broadcast %166 : vector<8x1xf32> to vector<8x32xf32>
    %168 = arith.mulf %163, %167 : vector<8x32xf32>
    %169 = vector.shape_cast %148 : vector<32xf32> to vector<1x32xf32>
    %170 = vector.broadcast %169 : vector<1x32xf32> to vector<8x32xf32>
    %171 = arith.mulf %168, %170 : vector<8x32xf32>
    %172 = vector.shape_cast %150 : vector<32xf32> to vector<1x32xf32>
    %173 = vector.broadcast %172 : vector<1x32xf32> to vector<8x32xf32>
    %174 = arith.addf %171, %173 : vector<8x32xf32>
    %175 = arith.truncf %174 : vector<8x32xf32> to vector<8x32xbf16>
    %c0_56 = arith.constant 0 : index
    %c0_57 = arith.constant 0 : index
    %176 = vector.load %arg11[%c0_56, %c0_57] : memref<32x64xbf16, #tpu.memory_space<vmem>>, vector<32x64xbf16>
    %cst_58 = arith.constant dense<0.000000e+00> : vector<8x64xf32>
    %177 = tpu.matmul %175, %176, %cst_58 {dimension_numbers = #tpu.dot_dimension_numbers<[1], [0], [0], [1], [0, 0, 1, 1], [], []>} : vector<8x32xbf16>, vector<32x64xbf16>, vector<8x64xf32> -> vector<8x64xf32>
    %c0_59 = arith.constant 0 : index
    %c0_60 = arith.constant 0 : index
    %178 = vector.load %arg12[%c0_59, %c0_60] : memref<1x64xf32, #tpu.memory_space<vmem>>, vector<1x64xf32>
    %179 = vector.shape_cast %178 : vector<1x64xf32> to vector<64xf32>
    %180 = vector.shape_cast %179 : vector<64xf32> to vector<1x64xf32>
    %181 = vector.broadcast %180 : vector<1x64xf32> to vector<8x64xf32>
    %182 = arith.addf %177, %181 : vector<8x64xf32>
    %cst_61 = arith.constant 0.000000e+00 : f32
    %183 = vector.broadcast %cst_61 : f32 to vector<8x64xf32>
    %184 = arith.maximumf %182, %183 : vector<8x64xf32>
    %185 = arith.truncf %184 : vector<8x64xf32> to vector<8x64xbf16>
    %c0_62 = arith.constant 0 : index
    %c0_63 = arith.constant 0 : index
    %186 = vector.load %arg13[%c0_62, %c0_63] : memref<64x32xbf16, #tpu.memory_space<vmem>>, vector<64x32xbf16>
    %cst_64 = arith.constant dense<0.000000e+00> : vector<8x32xf32>
    %187 = tpu.matmul %185, %186, %cst_64 {dimension_numbers = #tpu.dot_dimension_numbers<[1], [0], [0], [1], [0, 0, 1, 1], [], []>} : vector<8x64xbf16>, vector<64x32xbf16>, vector<8x32xf32> -> vector<8x32xf32>
    %c0_65 = arith.constant 0 : index
    %c0_66 = arith.constant 0 : index
    %188 = vector.load %arg14[%c0_65, %c0_66] : memref<1x32xf32, #tpu.memory_space<vmem>>, vector<1x32xf32>
    %189 = vector.shape_cast %188 : vector<1x32xf32> to vector<32xf32>
    %190 = vector.shape_cast %189 : vector<32xf32> to vector<1x32xf32>
    %191 = vector.broadcast %190 : vector<1x32xf32> to vector<8x32xf32>
    %192 = arith.addf %187, %191 : vector<8x32xf32>
    %193 = arith.addf %146, %192 : vector<8x32xf32>
    %c0_67 = arith.constant 0 : index
    %c0_68 = arith.constant 0 : index
    %c0_69 = arith.constant 0 : index
    %194 = vector.load %arg15[%c0_67, %c0_68, %c0_69] : memref<1x8x32xf32, #tpu.memory_space<vmem>>, vector<1x8x32xf32>
    %195 = vector.shape_cast %194 : vector<1x8x32xf32> to vector<8x32xf32>
    %196 = vector.shape_cast %193 : vector<8x32xf32> to vector<1x8x32xf32>
    tpu.vector_store %arg15[%c0_67, %c0_68, %c0_69], %196 {strides = array<i32>} : memref<1x8x32xf32, #tpu.memory_space<vmem>>, vector<1x8x32xf32>,
    return
  }
  func.func @transform_0(%arg0: i32) -> (i32, i32, i32) {
    %c0_i32 = arith.constant 0 : i32
    %c0_i32_0 = arith.constant 0 : i32
    %c0_i32_1 = arith.constant 0 : i32
    return %arg0, %c0_i32, %c0_i32_0 : i32, i32, i32
  }
  func.func @transform_1(%arg0: i32) -> (i32, i32, i32) {
    %c0_i32 = arith.constant 0 : i32
    %c0_i32_0 = arith.constant 0 : i32
    %c0_i32_1 = arith.constant 0 : i32
    return %arg0, %c0_i32, %c0_i32_0 : i32, i32, i32
  }
  func.func @transform_2(%arg0: i32) -> (i32, i32) {
    %c0_i32 = arith.constant 0 : i32
    %c0_i32_0 = arith.constant 0 : i32
    %c0_i32_1 = arith.constant 0 : i32
    return %c0_i32, %c0_i32_0 : i32, i32
  }
  func.func @transform_3(%arg0: i32) -> (i32, i32) {
    %c0_i32 = arith.constant 0 : i32
    %c0_i32_0 = arith.constant 0 : i32
    %c0_i32_1 = arith.constant 0 : i32
    return %c0_i32, %c0_i32_0 : i32, i32
  }
  func.func @transform_4(%arg0: i32) -> (i32, i32) {
    %c0_i32 = arith.constant 0 : i32
    %c0_i32_0 = arith.constant 0 : i32
    %c0_i32_1 = arith.constant 0 : i32
    return %c0_i32, %c0_i32_0 : i32, i32
  }
  func.func @transform_5(%arg0: i32) -> (i32, i32) {
    %c0_i32 = arith.constant 0 : i32
    %c0_i32_0 = arith.constant 0 : i32
    %c0_i32_1 = arith.constant 0 : i32
    return %c0_i32, %c0_i32_0 : i32, i32
  }
  func.func @transform_6(%arg0: i32) -> (i32, i32) {
    %c0_i32 = arith.constant 0 : i32
    %c0_i32_0 = arith.constant 0 : i32
    %c0_i32_1 = arith.constant 0 : i32
    return %c0_i32, %c0_i32_0 : i32, i32
  }
  func.func @transform_7(%arg0: i32) -> (i32, i32) {
    %c0_i32 = arith.constant 0 : i32
    %c0_i32_0 = arith.constant 0 : i32
    %c0_i32_1 = arith.constant 0 : i32
    return %c0_i32, %c0_i32_0 : i32, i32
  }
  func.func @transform_8(%arg0: i32) -> (i32, i32) {
    %c0_i32 = arith.constant 0 : i32
    %c0_i32_0 = arith.constant 0 : i32
    %c0_i32_1 = arith.constant 0 : i32
    return %c0_i32, %c0_i32_0 : i32, i32
  }
  func.func @transform_9(%arg0: i32) -> (i32, i32) {
    %c0_i32 = arith.constant 0 : i32
    %c0_i32_0 = arith.constant 0 : i32
    %c0_i32_1 = arith.constant 0 : i32
    return %c0_i32, %c0_i32_0 : i32, i32
  }
  func.func @transform_10(%arg0: i32) -> (i32, i32) {
    %c0_i32 = arith.constant 0 : i32
    %c0_i32_0 = arith.constant 0 : i32
    %c0_i32_1 = arith.constant 0 : i32
    return %c0_i32, %c0_i32_0 : i32, i32
  }
  func.func @transform_11(%arg0: i32) -> (i32, i32) {
    %c0_i32 = arith.constant 0 : i32
    %c0_i32_0 = arith.constant 0 : i32
    %c0_i32_1 = arith.constant 0 : i32
    return %c0_i32, %c0_i32_0 : i32, i32
  }
  func.func @transform_12(%arg0: i32) -> (i32, i32) {
    %c0_i32 = arith.constant 0 : i32
    %c0_i32_0 = arith.constant 0 : i32
    %c0_i32_1 = arith.constant 0 : i32
    return %c0_i32, %c0_i32_0 : i32, i32
  }
  func.func @transform_13(%arg0: i32) -> (i32, i32) {
    %c0_i32 = arith.constant 0 : i32
    %c0_i32_0 = arith.constant 0 : i32
    %c0_i32_1 = arith.constant 0 : i32
    return %c0_i32, %c0_i32_0 : i32, i32
  }
  func.func @transform_14(%arg0: i32) -> (i32, i32, i32) {
    %c0_i32 = arith.constant 0 : i32
    %c0_i32_0 = arith.constant 0 : i32
    %c0_i32_1 = arith.constant 0 : i32
    return %arg0, %c0_i32, %c0_i32_0 : i32, i32, i32
  }
}

</mosaic_0001>

<bundles_post_ra>
// kernel: tpu_custom_call.1
= control target key start
LH: loop header
LB: loop body
LE: loop exit
PB: predicated region body
PF: predicated region fallthrough
CT: control target
= control target key end

     0   :  { %s2539_s0 = inlined_call_operand.hbm [shape: f32[2,1,8], index: 0, kind: input, shape index: {}]   ;;  %s2540_s1 = inlined_call_operand.vmem [shape: f32[2,8,32], index: 1, kind: input, shape index: {}]   ;;  %s2541_s2 = inlined_call_operand.vmem [shape: bf16[32,96], index: 2, kind: input, shape index: {}]   ;;  %s2542_s3 = inlined_call_operand.vmem [shape: f32[1,96], index: 3, kind: input, shape index: {}]   ;;  %s2543_s4 = inlined_call_operand.vmem [shape: bf16[32,32], index: 4, kind: input, shape index: {}]   ;;  %s2544_s5 = inlined_call_operand.vmem [shape: f32[1,32], index: 5, kind: input, shape index: {}]   ;;  %s2545_s6 = inlined_call_operand.hbm [shape: f32[1,32], index: 6, kind: input, shape index: {}]   ;;  %s2546_s7 = inlined_call_operand.hbm [shape: f32[1,32], index: 7, kind: input, shape index: {}]   ;;  %s2547_s8 = inlined_call_operand.hbm [shape: f32[1,32], index: 8, kind: input, shape index: {}]   ;;  %s2548_s9 = inlined_call_operand.hbm [shape: f32[1,32], index: 9, kind: input, shape index: {}]   ;;  %s2549_s10 = inlined_call_operand.vmem [shape: bf16[32,64], index: 10, kind: input, shape index: {}]   ;;  %s2550_s11 = inlined_call_operand.vmem [shape: f32[1,64], index: 11, kind: input, shape index: {}]   ;;  %s2551_s12 = inlined_call_operand.vmem [shape: bf16[64,32], index: 12, kind: input, shape index: {}]   ;;  %s2552_s13 = inlined_call_operand.vmem [shape: f32[1,32], index: 13, kind: input, shape index: {}]   ;;  %s2553_s14 = inlined_call_operand.hbm [shape: f32[2,8,32], index: 14, kind: output, shape index: {}]  }
   0x1   :  { %2560 = sst [smem:[#allocation17_spill]] %s2539_s0 }
   0x2   :  { %2561 = sst [smem:[#allocation18_spill]] %s2545_s6 }
   0x3   :  { %2562 = sst [smem:[#allocation19_spill]] %s2549_s10 }
   0x4   :  { %2563 = sst [smem:[#allocation20_spill]] %s2550_s11 }
   0x5   :  { %2564 = sst [smem:[#allocation21_spill]] %s2551_s12 }
   0x6   :  { %2565 = sst [smem:[#allocation22_spill]] %s2552_s13 }
   0x7   :  { %2566 = sst [smem:[#allocation23_spill]] %s2553_s14 }
   0x8   :  { %19 = vsyncpa [#allocation4], 0 }
   0x9   :  { %21 = vsyncpa [#allocation4 + $0x1], 0 }
   0xa   :  { %22 = vsyncpa [#allocation7], 0 }
   0xb   :  { %23 = vsyncpa [#allocation10], 0 }
   0xc   :  { %24 = vsyncpa [#allocation5], 0 }
   0xd   :  { %26 = vsyncpa [#allocation5 + $0x1], 0  ;;  %s2113_s29 = smov 0   ;;  %s2115_s30 = smov 0  }
   0xe   :  { %s2117_s15 = smov 0   ;;  %s2119_s16 = smov 0  }
   0xf LB: > { %s2016_s17 = smov [#allocation6]   ;;  %s2134_s19 = sadd.s32 4294967295, %s2014_s16   ;;  %s2014_s16 = sphi %s2119_s16, %s2594_s16   ;;  %s2010_s15 = sphi %s2117_s15, %s2593_s15   ;;  %s2006_s30 = sphi %s2115_s30, %s2592_s30   ;;  %s2002_s29 = sphi %s2113_s29, %s2591_s29  }
  0x10   : > { %s392_s18 = sshll.u32 %s2016_s17, 4  ;;  %p1502_p0 = scmp.ge.s32.totalorder %s2014_s16, 1  ;;  %s2139_s18 = int_to_ptr.vmem [resolvable:$true] %s392_s18 }
  0x11   : > { %p2557_p1 = scmp.eq.s32.totalorder %s2134_s19, 0  ;;  %p367_p2 = scmp.lt.s32.totalorder %s2014_s16, 3 }
  0x12   : > { %s2017_s21 = smov [#allocation9]   ;;  %s2018_s23 = smov [#allocation8]  }
  0x13   : > { %p2141_p3 = pnand %p1502_p0, %p367_p2  ;;  %s414_s22 = sshll.u32 %s2017_s21, 4  ;;  %s2148_s22 = int_to_ptr.vmem [resolvable:$true] %s414_s22 }
  0x14   : > { %s403_s24 = sshll.u32 %s2018_s23, 4  ;;  %s2019_s26 = smov [#allocation11]   ;;  %s2156_s24 = int_to_ptr.vmem [resolvable:$true] %s403_s24 }
  0x15   : > { %s2567_s20 = scalar_select %p2141_p3, 1, 0 }
  0x16   : > { %p1685_p5 = pneg %p2141_p3  ;;  %s2158_s27 = sshll.u32 %s2019_s26, 4  ;;  %s426_s27 = int_to_ptr.vmem [resolvable:$true] %s2158_s27 }
  0x17   : > { %s2569_s6 = sld [smem:[#allocation18_spill]] }
  0x18   : > { %p2152_p6 = pnand %p1685_p5, %p2557_p1 }
  0x1a   : > { %p2168_p8 = pneg %p2152_p6 }
  0x1d   : > { %s1798_s14 = scalar_lea.hbm %s2569_s6, 16 }
  0x1e   : > { %p1799_p7 = scmp.ne.s32.totalorder %s2569_s6, %s1798_s14  ;;  %p1805_p11 = scmp.lt.u32.totalorder %s1798_s14, %s2569_s6 }
  0x20   : > { %p1801_p9 = pnand %p2168_p8, %p1799_p7 }
  0x22   : > { %p1802_p10 = pneg %p1801_p9 }
  0x24   : > { %p1807_p12 = pnand %p1805_p11, %p1802_p10 }
  0x26   : > { %1810 = shalt.err (!%p1807_p12)
}
  0x27   : > { %s1811_s13 = scalar_lea.vmem %s2139_s18, 16  ;;  %s1818_s28 = scalar_lea.vmem %s2139_s18, 32 }
  0x28   : > { %p1812_p13 = scmp.ne.s32.totalorder %s2139_s18, %s1811_s13  ;;  %p1819_p5 = scmp.lt.s32.totalorder %s2139_s18, %s2139_s18 }
  0x29   : > { %p1820_p7 = scmp.lt.s32.totalorder %s1818_s28, %s1811_s13 }
  0x2a   : > { %p1814_p0 = pnand %p1812_p13, %p2168_p8 }
  0x2b   : > { %p1821_p9 = por %p1820_p7, %p1819_p5 }
  0x2c   : > { %p1815_p2 = pneg %p1814_p0 }
  0x2e   : > { %p1822_p4 = pnand %p1821_p9, %p1815_p2 }
  0x30   : > { %1825 = shalt.err (!%p1822_p4)
}
  0x31   : > { %1688 = dma.hbm_to_vmem [thread:$0]  (!%p2152_p6), %s2569_s6, 16, %s2139_s18, [#allocation7]  }
  0x32   : > { %s1826_s26 = scalar_lea.hbm %s2547_s8, 16 }
  0x33   : > { %p1827_p10 = scmp.ne.s32.totalorder %s2547_s8, %s1826_s26  ;;  %p1833_p4 = scmp.lt.u32.totalorder %s1826_s26, %s2547_s8 }
  0x35   : > { %p1829_p11 = pnand %p1827_p10, %p2168_p8 }
  0x37   : > { %p1830_p12 = pneg %p1829_p11 }
  0x39   : > { %p1835_p13 = pnand %p1833_p4, %p1830_p12 }
  0x3b   : > { %1838 = shalt.err (!%p1835_p13)
}
  0x3c   : > { %s1839_s18 = scalar_lea.vmem %s2148_s22, 16  ;;  %s1846_s10 = scalar_lea.vmem %s2148_s22, 32 }
  0x3d   : > { %p1840_p0 = scmp.ne.s32.totalorder %s2148_s22, %s1839_s18  ;;  %p1847_p7 = scmp.lt.s32.totalorder %s2148_s22, %s2148_s22 }
  0x3e   : > { %p1848_p9 = scmp.lt.s32.totalorder %s1846_s10, %s1839_s18 }
  0x3f   : > { %p1842_p2 = pnand %p1840_p0, %p2168_p8 }
  0x40   : > { %p1849_p10 = por %p1848_p9, %p1847_p7 }
  0x41   : > { %p1843_p5 = pneg %p1842_p2 }
  0x43   : > { %p1850_p11 = pnand %p1849_p10, %p1843_p5 }
  0x45   : > { %1853 = shalt.err (!%p1850_p11)
}
  0x46   : > { %1694 = dma.hbm_to_vmem [thread:$0]  (!%p2152_p6), %s2547_s8, 16, %s2148_s22, [#allocation10]  }
  0x47   : > { %s1854_s21 = scalar_lea.hbm %s2546_s7, 16 }
  0x48   : > { %p1855_p12 = scmp.ne.s32.totalorder %s2546_s7, %s1854_s21  ;;  %p1861_p0 = scmp.lt.u32.totalorder %s1854_s21, %s2546_s7 }
  0x4a   : > { %p1857_p4 = pnand %p1855_p12, %p2168_p8 }
  0x4c   : > { %p1858_p13 = pneg %p1857_p4 }
  0x4e   : > { %p1863_p2 = pnand %p1861_p0, %p1858_p13 }
  0x50   : > { %1866 = shalt.err (!%p1863_p2)
}
  0x51   : > { %s1867_s22 = scalar_lea.vmem %s2156_s24, 16  ;;  %s1874_s10 = scalar_lea.vmem %s2156_s24, 32 }
  0x52   : > { %p1868_p5 = scmp.ne.s32.totalorder %s2156_s24, %s1867_s22  ;;  %p1875_p10 = scmp.lt.s32.totalorder %s2156_s24, %s2156_s24 }
  0x53   : > { %p1876_p11 = scmp.lt.s32.totalorder %s1874_s10, %s1867_s22 }
  0x54   : > { %p1870_p7 = pnand %p1868_p5, %p2168_p8 }
  0x55   : > { %p1877_p12 = por %p1876_p11, %p1875_p10 }
  0x56   : > { %p1871_p9 = pneg %p1870_p7 }
  0x58   : > { %p1878_p4 = pnand %p1877_p12, %p1871_p9 }
  0x5a   : > { %1881 = shalt.err (!%p1878_p4)
}
  0x5b   : > { %1691 = dma.hbm_to_vmem [thread:$0]  (!%p2152_p6), %s2546_s7, 16, %s2156_s24, [#allocation7]  }
  0x5c   : > { %s1882_s21 = scalar_lea.hbm %s2548_s9, 16 }
  0x5d   : > { %p1883_p13 = scmp.ne.s32.totalorder %s2548_s9, %s1882_s21  ;;  %p1889_p5 = scmp.lt.u32.totalorder %s1882_s21, %s2548_s9 }
  0x5f   : > { %p1885_p0 = pnand %p1883_p13, %p2168_p8 }
  0x61   : > { %p1886_p2 = pneg %p1885_p0 }
  0x63   : > { %p1891_p7 = pnand %p1889_p5, %p1886_p2 }
  0x65   : > { %1894 = shalt.err (!%p1891_p7)
}
  0x66   : > { %s1895_s22 = scalar_lea.vmem %s426_s27, 16  ;;  %s1902_s24 = scalar_lea.vmem %s426_s27, 32 }
  0x67   : > { %p1896_p9 = scmp.ne.s32.totalorder %s426_s27, %s1895_s22  ;;  %p1903_p12 = scmp.lt.s32.totalorder %s426_s27, %s426_s27 }
  0x68   : > { %p1904_p4 = scmp.lt.s32.totalorder %s1902_s24, %s1895_s22 }
  0x69   : > { %p1898_p10 = pnand %p1896_p9, %p2168_p8 }
  0x6a   : > { %p1905_p1 = por %p1904_p4, %p1903_p12 }
  0x6b   : > { %p1899_p11 = pneg %p1898_p10 }
  0x6d   : > { %p1906_p3 = pnand %p1905_p1, %p1899_p11 }
  0x6f   : > { %1909 = shalt.err (!%p1906_p3)
}
  0x70   : > { %1697 = dma.hbm_to_vmem [thread:$0]  (!%p2152_p6), %s2548_s9, 16, %s426_s27, [#allocation10]  }
  0x71   : > { %s1501_s23 = sadd.s32 4294967294, %s2014_s16   ;;  %s2259_s25 = sadd.s32 1, %s2014_s16  }
  0x72   : > { %s36_s11 = ssub.s32 %s2014_s16, %s2259_s25  ;;  %s39_s14 = sadd.s32 1, %s2010_s15 }
  0x73   : > { %p37_p1 = scmp.eq.s32.totalorder %s36_s11, 0  ;;  %p46_p3 = scmp.ne.s32.totalorder %s2010_s15, %s2006_s30 }
  0x74   : > { %p47_p8 = scmp.eq.s32.totalorder %s2014_s16, 0  ;;  %p52_p13 = scmp.ne.s32.totalorder %s2006_s30, %s2002_s29 }
  0x75   : > { %s2270_s17 = scalar_select %p37_p1, %s2010_s15, %s39_s14  }
  0x76   : > { %p2272_p0 = por %p47_p8, %p46_p3  ;;  %p2572_p2 = scmp.eq.s32.totalorder %s2134_s19, 0 }
  0x77   : > { %p354_p5 = scmp.eq.s32.totalorder %s2134_s19, 1  ;;  %p360_p7 = scmp.eq.s32.totalorder %s1501_s23, 1 }
  0x78   : > { %p2278_p6 = por %p2572_p2, %p52_p13  ;;  %p1710_p9 = scmp.lt.s32.totalorder %s2014_s16, 2 }
  0x79   : > { %s448_s26 = sand.u32 1, %s2010_s15   ;;  %p2285_p10 = por %p354_p5, %p46_p3 }
  0x7a   : > { %p2289_p11 = por %p360_p7, %p52_p13  ;;  %s1508_s18 = sshll.u32 %s2014_s16, 4 }
  0x7b   : > { %s2574_s13 = scalar_select %p2285_p10, 1, 0 }
  0x7c   : > { %s2575_s28 = scalar_select %p2289_p11, 1, 0 }
  0x7d   : > { %s451_s22 = scalar_lea.vmem [#allocation3], %s448_s26  ;;  %s2576_s0 = sld [smem:[#allocation17_spill]] }
  0x7e   : > { %s458_s24 = sshll.u32 %s451_s22, 4  ;;  %p2303_p12 = pnand %p1710_p9, %p2272_p0  ;;  %s2299_s24 = int_to_ptr.vmem [resolvable:$true] %s458_s24 }
  0x7f   : > { %s449_s14 = scalar_lea.sflag [#allocation4], %s448_s26 }
  0x80   : > { %p1912_p1 = pneg %p2303_p12 }
  0x83   : > { %s2297_s11 = scalar_lea.hbm %s2576_s0, %s1508_s18  ;;  %s1915_s12 = scalar_lea.hbm %s2576_s0, 32 }
  0x84   : > { %s1910_s22 = scalar_lea.hbm %s2297_s11, 16  ;;  %p1916_p13 = scmp.lt.u32.totalorder %s2297_s11, %s2576_s0 }
  0x85   : > { %p1911_p4 = scmp.ne.s32.totalorder %s2297_s11, %s1910_s22  ;;  %p1917_p0 = scmp.lt.u32.totalorder %s1915_s12, %s1910_s22 }
  0x86   : > { %p1919_p5 = scmp.lt.u32.totalorder %s1910_s22, %s2297_s11 }
  0x87   : > { %p1913_p3 = pnand %p1912_p1, %p1911_p4  ;;  %p1918_p2 = por %p1917_p0, %p1916_p13 }
  0x89   : > { %p1914_p8 = pneg %p1913_p3  ;;  %p1920_p7 = por %p1919_p5, %p1918_p2 }
  0x8b   : > { %p1921_p9 = pnand %p1920_p7, %p1914_p8 }
  0x8d   : > { %1924 = shalt.err (!%p1921_p9)
}
  0x8e   : > { %s1925_s26 = scalar_lea.vmem %s2299_s24, 16  ;;  %s2020_s18 = smov [#allocation3]  }
  0x8f   : > { %p1926_p4 = scmp.ne.s32.totalorder %s2299_s24, %s1925_s26  ;;  %s1930_s10 = sshll.u32 %s2020_s18, 4  ;;  %s1931_s10 = int_to_ptr.vmem [resolvable:$false] %s1930_s10 }
  0x90   : > { %s1932_s6 = scalar_lea.vmem %s1931_s10, 32  ;;  %p1933_p10 = scmp.lt.s32.totalorder %s2299_s24, %s1931_s10 }
  0x91   : > { %p1928_p3 = pnand %p1926_p4, %p1912_p1  ;;  %p1934_p13 = scmp.lt.s32.totalorder %s1932_s6, %s1925_s26 }
  0x93   : > { %p1929_p11 = pneg %p1928_p3  ;;  %p1935_p0 = por %p1934_p13, %p1933_p10 }
  0x95   : > { %p1936_p2 = pnand %p1935_p0, %p1929_p11 }
  0x97   : > { %1939 = shalt.err (!%p1936_p2)
}
  0x98   : > { %1701 = dma.hbm_to_vmem [thread:$0]  (!%p2303_p12), %s2297_s11, 16, %s2299_s24, %s449_s14  }
  0x99   : > { %p2578_p8 = scmp.ne.s32.totalorder %s2567_s20, 0 }
  0x9a   : > { %s2335_s22 = sand.u32 (!%p2578_p8), 1, %s2006_s30  }
  0x9b   : > { %474 = sbr.rel (%p2578_p8) target bundleno = 2737 (0xab1), region = 76  ;;  %s477_s12 = scalar_lea.sflag (!%p2578_p8), [#allocation4], %s2335_s22 }
  0x9c   : > { %s479_s21 = scalar_lea.vmem (!%p2578_p8), [#allocation3], %s2335_s22 }
  0xa2   : > { %1985 = dma.done.wait (%p2278_p6), %s477_s12, 16  }
  0xa3   : > { %1987 = vsyncadd (%p2278_p6), %s477_s12, 4294967280  ;;  %p2579_p10 = scmp.eq.s32.totalorder %s2134_s19, 0 }
  0xa5   : > { %1989 = dma.done.wait (%p2579_p10), [#allocation7], 32   ;;  %p2580_p11 = pmov %p2579_p10 }
  0xa6   : > { %p2581_p12 = pmov %p2579_p10 }
  0xa7   : > { %1991 = vsyncadd (%p2580_p11), [#allocation7], 4294967264 }
  0xa8   : > { %1993 = dma.done.wait (%p2581_p12), [#allocation10], 32   ;;  %p2582_p1 = pmov %p2579_p10 }
  0xa9   : > { %p543_p5 = scmp.lt.s32.totalorder %s2134_s19, 1  ;;  %vm552_vm0 = vcmask 261120   ;;  %v1768_v7 = vld [vmem:[%s2541_s2] sm:$0xff]   ;;  %v2021_v8 = vmov 0.0   ;;  %vm2022_vm1 = vmmov 0   ;;  %v1769_v9 = vld [vmem:[%s2541_s2 + $0x8] sm:$0xff]  }
  0xaa   : > { %1995 = vsyncadd (%p2582_p1), [#allocation10], 4294967264  ;;  %1581 = vmatprep.subr.bf16.mxu0 %v2021_v8  ;;  %1585 = vmatprep.mubr.msk.bf16.mxu0 %vm2022_vm1, %v2021_v8  ;;  %v1516_v14 = vld [vmem:[#allocation6] ss:$0 sm:$0xff]  ;;  %v1517_v16 = vld [vmem:[#allocation8] ss:$0 sm:$0xff] }
  0xab   : > { %s544_s20 = scalar_select %p543_p5, %s2134_s19, 1  ;;  %1582 = vmatpush3.bf16.msra.mxu0 %v1768_v7  ;;  %1589 = vmatprep.subr.bf16.mxu1 %v2021_v8  ;;  %v1518_v20 = vld [vmem:[%s2542_s3] ss:$0 sm:$0xff]  ;;  %vm660_vm2 = vcmask 64512   ;;  %vm724_vm3 = vcmask 1043456   ;;  %vm884_vm4 = vcmask 130112  }
  0xac   : > { %1583 = vmatprep.subr.bf16.mxu0 %v2021_v8  ;;  %1591 = vmatprep.mubr.msk.bf16.mxu1 %vm2022_vm1, %v2021_v8  ;;  %s2025_s11 = smov 88   ;;  %s2026_s27 = smov 80   ;;  %v1522_v40 = vld [vmem:[%s479_s21] ss:$0 sm:$0xff]  ;;  %vm1000_vm5 = vcmask 195712   ;;  %vm1116_vm6 = vcmask 261312  }
  0xad   : > { %s1515_s24 = sshll.u32 %s544_s20, 3  ;;  %s2023_s20 = smov 96   ;;  %vm1324_vm7 = vcmask 523264  }
  0xae   : > { %s546_s23 = scalar_lea.vmem %s2540_s1, %s1515_s24  ;;  %s2024_s24 = smov 120  }
  0xaf   : > { %v2356_v0 = vld [vmem:[%s546_s23] sm:$0xff]  ;;  %1584 = vmatpush3.bf16.msra.mxu0 %v1769_v9  ;;  %s2027_s23 = smov 112   ;;  %s2028_s14 = smov 72  }
  0xb0   : > { %v553_v1 = vsel %vm552_vm0, %v2356_v0, 0.0  ;;  %1595 = vmatprep.subr.bf16.mxu0 %v2021_v8  ;;  %s2029_s26 = smov 104   ;;  %s2030_s21 = smov 64  }
  0xb1   : > { %554 = vadd.xlane.f32.xlu0 %v553_v1  ;;  %s2031_s18 = smov 56   ;;  %s2032_s10 = smov 48  }
  0xb2   : > { %s2033_s6 = smov 40   ;;  %s2034_s12 = smov 8  }
  0xb3   : > { %p2588_p7 = scmp.ne.s32.totalorder %s2574_s13, 0 }
 0x13e   : > { %v555_v2 = vpop.xlane.xlu0 %554 }
 0x13f   : > { %v557_v3 = vmul.f32 0.03125, %v555_v2 }
 0x141   : > { %v558_v4 = vsub.f32 %v2356_v0, %v557_v3 }
 0x143   : > { %v559_v5 = vmul.f32 %v558_v4, %v558_v4 }
 0x145   : > { %v560_v6 = vsel %vm552_vm0, %v559_v5, 0.0 }
 0x146   : > { %561 = vadd.xlane.f32.xlu0 %v560_v6 }
 0x1d3   : > { %v562_v10 = vpop.xlane.xlu0 %561 }
 0x1d4   : > { %v563_v11 = vmul.f32 0.03125, %v562_v10 }
 0x1d6   : > { %v564_v12 = vadd.f32 1e-05, %v563_v11 }
 0x1d8   : > { %1778 = vrsqrt.f32 %v564_v12 }
 0x1e2   : > { %v1779_v13 = vpop.eup %1778 }
 0x1e3   : > { %v566_v15 = vmul.f32 %v1779_v13, %v558_v4 }
 0x1e5   : > { %v573_v17 = vmul.f32 %v1516_v14, %v566_v15 }
 0x1e7   : > { %v580_v18 = vadd.f32 %v1517_v16, %v573_v17 }
 0x1e9   : > { %v581_v19 = vpack.c.bf16 %v580_v18, %v580_v18 }
 0x1eb   : > { %1586 = vmatmul.mubr.msk.bf16.vlgmr.msra.gmra.mrb[0].mxu0 %vm552_vm0, %v581_v19 }
 0x1ec   : > { %1597 = vmatprep.mubr.msk.bf16.mxu0 %vm2022_vm1, %v2021_v8 }
 0x2be   : > { %v642_v21 = vpop.f32.mrb[0].mxu0 }
 0x2bf   : > { %v643_v22 = vadd.f32 %v1518_v20, %v642_v21  ;;  %v1587_v23 = vpop.f32.mrb[1].mxu0 }
 0x2c0   : > { %v645_v24 = vpop.f32.mrb[2].mxu0 }
 0x2c1   : > { %v648_v25 = vmul.f32 0.35355338, %v643_v22  ;;  %v2382_v26 = vpack.c.bf16 %v643_v22, %v643_v22  ;;  %v1588_v27 = vpop.f32.mrb[3].mxu0 }
 0x2c3   : > { %v649_v28 = vpack.c.bf16 %v648_v25, %v648_v25  ;;  %658 = vrot.lane.b32.xlu1 %v2382_v26, %s2023_s20 }
 0x2c5   : > { %770 = vrot.lane.b32.xlu0 %v649_v28, %s2024_s24  ;;  %s2585_s24 = sld [smem:[#allocation20_spill]] }
 0x2c7   : > { %772 = vrot.lane.b32.xlu1 %v2382_v26, %s2025_s11  ;;  %s1514_s11 = sshll.u32 %s2335_s22, 3 }
 0x2cb   : > { %888 = vrot.lane.b32.xlu1 %v2382_v26, %s2026_s27  ;;  %s2584_s27 = sld [smem:[#allocation21_spill]] }
 0x2cf   : > { %886 = vrot.lane.b32.xlu1 %v649_v28, %s2027_s23  ;;  %s2035_s23 = smov 16  }
 0x2d3   : > { %1004 = vrot.lane.b32.xlu1 %v2382_v26, %s2028_s14  ;;  %s2036_s14 = smov 24  }
 0x2d7   : > { %1002 = vrot.lane.b32.xlu1 %v649_v28, %s2029_s26  ;;  %s2586_s26 = sld [smem:[#allocation22_spill]] }
 0x335   : > { %v659_v29 = vpop.permute.xlu1 %658 }
 0x336   : > { %v665_v30 = vsel %vm660_vm2, %v659_v29, 0 }
 0x337   : > { %1590 = vmatpush3.bf16.xpose.msra.mxu1 %v665_v30  ;;  %v771_v34 = vpop.permute.xlu0 %770 }
 0x338   : > { %1601 = vmatprep.subr.bf16.mxu1 %v2021_v8 }
 0x339   : > { %v773_v31 = vpop.permute.xlu1 %772 }
 0x33a   : > { %v778_v32 = vsel %vm660_vm2, %v773_v31, 0 }
 0x33d   : > { %v889_v33 = vpop.permute.xlu1 %888 }
 0x33e   : > { %1592 = vmatmul.mubr.msk.bf16.vlgmr.msra.gmra.mrb[0].mxu1 %vm660_vm2, %v649_v28  ;;  %v894_v36 = vsel %vm660_vm2, %v889_v33, 0 }
 0x33f   : > { %1602 = vmatpush3.bf16.xpose.msra.mxu1 %v778_v32  ;;  %1603 = vmatprep.mubr.msk.bf16.mxu1 %vm2022_vm1, %v2021_v8 }
 0x340   : > { %1613 = vmatprep.subr.bf16.mxu1 %v2021_v8 }
 0x341   : > { %v887_v35 = vpop.permute.xlu1 %886 }
 0x345   : > { %v1005_v37 = vpop.permute.xlu1 %1004 }
 0x346   : > { %1604 = vmatmul.mubr.msk.bf16.vlgmr.msra.gmra.mrb[4].mxu1 %vm660_vm2, %v771_v34  ;;  %v1010_v38 = vsel %vm660_vm2, %v1005_v37, 0 }
 0x347   : > { %1614 = vmatpush3.bf16.xpose.msra.mxu1 %v894_v36  ;;  %1615 = vmatprep.mubr.msk.bf16.mxu1 %vm2022_vm1, %v2021_v8 }
 0x348   : > { %1625 = vmatprep.subr.bf16.mxu1 %v2021_v8 }
 0x349   : > { %v1003_v39 = vpop.permute.xlu1 %1002 }
 0x34e   : > { %1616 = vmatmul.mubr.msk.bf16.vlgmr.msra.gmra.mrb[8].mxu1 %vm660_vm2, %v887_v35 }
 0x34f   : > { %1626 = vmatpush3.bf16.xpose.msra.mxu1 %v1010_v38  ;;  %1627 = vmatprep.mubr.msk.bf16.mxu1 %vm2022_vm1, %v2021_v8 }
 0x350   : > { %1637 = vmatprep.subr.bf16.mxu1 %v2021_v8 }
 0x356   : > { %1628 = vmatmul.mubr.msk.bf16.vlgmr.msra.gmra.mrb[12].mxu1 %vm660_vm2, %v1003_v39 }
 0x357   : > { %1641 = vmatprep.mubr.msk.bf16.mxu1 %vm2022_vm1, %v2021_v8 }
 0x411   : > { %v701_v41 = vpop.f32.mrb[0].mxu1 }
 0x412   : > { %v702_v42 = vadd.f32 %v1522_v40, %v701_v41  ;;  %v1593_v43 = vpop.f32.mrb[1].mxu1 }
 0x413   : > { %v704_v44 = vpop.f32.mrb[2].mxu1 }
 0x414   : > { %v1594_v45 = vpop.f32.mrb[3].mxu1  ;;  %v707_v46 = vsel %vm660_vm2, %v702_v42, -inf }
 0x415   : > { %708 = vmax.xlane.f32.xlu1 %v707_v46 }
 0x419   : > { %v814_v47 = vpop.f32.mrb[4].mxu1 }
 0x41a   : > { %v815_v48 = vadd.f32 %v1522_v40, %v814_v47  ;;  %v1605_v49 = vpop.f32.mrb[5].mxu1 }
 0x41b   : > { %v817_v50 = vpop.f32.mrb[6].mxu1 }
 0x41c   : > { %v1606_v51 = vpop.f32.mrb[7].mxu1  ;;  %v820_v52 = vsel %vm660_vm2, %v815_v48, -inf }
 0x41d   : > { %821 = vmax.xlane.f32.xlu0 %v820_v52 }
 0x421   : > { %v930_v53 = vpop.f32.mrb[8].mxu1 }
 0x422   : > { %v931_v54 = vadd.f32 %v1522_v40, %v930_v53  ;;  %v1617_v55 = vpop.f32.mrb[9].mxu1 }
 0x423   : > { %v933_v56 = vpop.f32.mrb[10].mxu1  ;;  %v1770_v55 = vld [vmem:[%s2543_s4] sm:$0xff]  }
 0x424   : > { %v1618_v57 = vpop.f32.mrb[11].mxu1  ;;  %v936_v58 = vsel %vm660_vm2, %v931_v54, -inf  ;;  %1638 = vmatpush3.bf16.msra.mxu1 %v1770_v55  ;;  %v1771_v56 = vld [vmem:[%s2543_s4 + $0x8] sm:$0xff]  }
 0x425   : > { %937 = vmax.xlane.f32.xlu1 %v936_v58  ;;  %1639 = vmatprep.subr.bf16.mxu1 %v2021_v8 }
 0x428   : > { %1640 = vmatpush3.bf16.msra.mxu1 %v1771_v56 }
 0x429   : > { %v1046_v59 = vpop.f32.mrb[12].mxu1  ;;  %1653 = vmatprep.subr.bf16.mxu1 %v2021_v8 }
 0x42a   : > { %v1047_v60 = vadd.f32 %v1522_v40, %v1046_v59  ;;  %v1629_v61 = vpop.f32.mrb[13].mxu1 }
 0x42b   : > { %v1049_v62 = vpop.f32.mrb[14].mxu1 }
 0x42c   : > { %v1630_v63 = vpop.f32.mrb[15].mxu1  ;;  %v1052_v1 = vsel %vm660_vm2, %v1047_v60, -inf }
 0x42d   : > { %1053 = vmax.xlane.f32.xlu0 %v1052_v1 }
 0x4a2   : > { %v709_v2 = vpop.xlane.xlu1 %708 }
 0x4a3   : > { %v710_v3 = vsub.f32 %v702_v42, %v709_v2 }
 0x4a5   : > { %v711_v4 = vmul.f32 1.442695, %v710_v3 }
 0x4a7   : > { %1780 = vpow2.f32 %v711_v4 }
 0x4aa   : > { %v822_v5 = vpop.xlane.xlu0 %821 }
 0x4ab   : > { %v823_v6 = vsub.f32 %v815_v48, %v822_v5 }
 0x4ad   : > { %v824_v7 = vmul.f32 1.442695, %v823_v6 }
 0x4af   : > { %1782 = vpow2.f32 %v824_v7  ;;  %v1531_v7 = vld [vmem:[%s2544_s5] ss:$0 sm:$0xff] }
 0x4b1   : > { %v1781_v9 = vpop.eup %1780 }
 0x4b2   : > { %v713_v10 = vsel %vm660_vm2, %v1781_v9, 0.0  ;;  %v938_v18 = vpop.xlane.xlu1 %937 }
 0x4b3   : > { %714 = vadd.xlane.f32.xlu1 %v713_v10  ;;  %v939_v19 = vsub.f32 %v931_v54, %v938_v18 }
 0x4b5   : > { %v940_v20 = vmul.f32 1.442695, %v939_v19 }
 0x4b9   : > { %v1783_v11 = vpop.eup %1782 }
 0x4ba   : > { %v1054_v12 = vpop.xlane.xlu0 %1053  ;;  %v826_v13 = vsel %vm660_vm2, %v1783_v11, 0.0 }
 0x4bb   : > { %v1055_v14 = vsub.f32 %v1047_v60, %v1054_v12  ;;  %827 = vadd.xlane.f32.xlu0 %v826_v13 }
 0x4bd   : > { %v1056_v15 = vmul.f32 1.442695, %v1055_v14 }
 0x4bf   : > { %1784 = vpow2.f32 %v1056_v15 }
 0x4c0   : > { %1786 = vpow2.f32 %v940_v20 }
 0x4c4   : > { %719 = vrot.lane.b32.xlu1 %v2382_v26, %s2030_s21  ;;  %s1548_s21 = sshll.u32 %s2134_s19, 7  ;;  %s1371_s19 = scalar_lea.sflag [#allocation5], %s2335_s22 }
 0x4c9   : > { %v1785_v16 = vpop.eup %1784 }
 0x4ca   : > { %v1058_v17 = vsel %vm660_vm2, %v1785_v16, 0.0  ;;  %v1787_v21 = vpop.eup %1786 }
 0x4cb   : > { %1059 = vadd.xlane.f32.xlu0 %v1058_v17  ;;  %v942_v22 = vsel %vm660_vm2, %v1787_v21, 0.0 }
 0x4e1   : > { %832 = vrot.lane.b32.xlu0 %v2382_v26, %s2031_s18  ;;  %s542_s18 = scalar_lea.vmem [#allocation12], %s1514_s11 }
 0x4e8   : > { %943 = vadd.xlane.f32.xlu1 %v942_v22  ;;  %v1774_v22 = vld [vmem:[%s2584_s27] sm:$0xff]  }
 0x4f9   : > { %948 = vrot.lane.b32.xlu1 %v2382_v26, %s2032_s10  ;;  %s1384_s10 = sshll.u32 %s542_s18, 4  ;;  %s2496_s10 = int_to_ptr.vmem [resolvable:$true] %s1384_s10 }
 0x4fa   : > { %s1940_s11 = scalar_lea.vmem %s2496_s10, 128 }
 0x4fb   : > { %p1941_p6 = scmp.ne.s32.totalorder %s2496_s10, %s1940_s11 }
 0x4fd   : > { %1064 = vrot.lane.b32.xlu1 %v2382_v26, %s2033_s6  ;;  %s2583_s6 = sld [smem:[#allocation19_spill]]  ;;  %p1942_p9 = pnand %p1941_p6, %p2588_p7 }
 0x4ff   : > { %p1943_p4 = pneg %p1942_p9 }
 0x540   : > { %v715_v23 = vpop.xlane.xlu1 %714 }
 0x541   : > { %1788 = vrcp.f32 %v715_v23  ;;  %v1775_v23 = vld [vmem:[%s2584_s27 + $0x8] sm:$0xff]  }
 0x544   : > { %v720_v24 = vpop.permute.xlu1 %719 }
 0x545   : > { %v726_v25 = vsel %vm724_vm3, %v720_v24, 0 }
 0x546   : > { %1596 = vmatpush3.bf16.msra.mxu0 %v726_v25 }
 0x547   : > { %1607 = vmatprep.subr.bf16.mxu0 %v2021_v8 }
 0x548   : > { %v828_v28 = vpop.xlane.xlu0 %827 }
 0x549   : > { %1790 = vrcp.f32 %v828_v28 }
 0x54b   : > { %v1789_v27 = vpop.eup %1788 }
 0x54c   : > { %v717_v29 = vmul.f32 %v1789_v27, %v1781_v9 }
 0x54e   : > { %v718_v30 = vpack.c.bf16 %v717_v29, %v717_v29  ;;  %v1535_v29 = vld [vmem:[#allocation9] ss:$0 sm:$0xff] }
 0x550   : > { %1598 = vmatmul.mubr.msk.bf16.vlgmr.msra.gmra.mrb[4].mxu0 %vm660_vm2, %v718_v30 }
 0x551   : > { %1609 = vmatprep.mubr.msk.bf16.mxu0 %vm2022_vm1, %v2021_v8 }
 0x553   : > { %v1791_v26 = vpop.eup %1790 }
 0x554   : > { %v830_v32 = vmul.f32 %v1791_v26, %v1783_v11  ;;  %v1536_v26 = vld [vmem:[#allocation11] ss:$0 sm:$0xff] }
 0x556   : > { %v831_v35 = vpack.c.bf16 %v830_v32, %v830_v32 }
 0x558   : > { %v1060_v31 = vpop.xlane.xlu0 %1059 }
 0x55c   : > { %v833_v33 = vpop.permute.xlu0 %832 }
 0x55d   : > { %v838_v34 = vsel %vm724_vm3, %v833_v33, 0 }
 0x55e   : > { %1608 = vmatpush3.bf16.msra.mxu0 %v838_v34  ;;  %v1776_v34 = vld [vmem:[%s2584_s27 + $0x10] sm:$0xff]  }
 0x55f   : > { %1619 = vmatprep.subr.bf16.mxu0 %v2021_v8 }
 0x561   : > { %1610 = vmatmul.mubr.msk.bf16.vlgmr.msra.gmra.mrb[8].mxu0 %vm660_vm2, %v831_v35  ;;  %v1777_v35 = vld [vmem:[%s2584_s27 + $0x18] sm:$0xff]  }
 0x562   : > { %1621 = vmatprep.mubr.msk.bf16.mxu0 %vm2022_vm1, %v2021_v8 }
 0x575   : > { %v944_v36 = vpop.xlane.xlu1 %943 }
 0x576   : > { %1792 = vrcp.f32 %v944_v36  ;;  %v1537_v36 = vld [vmem:[%s2585_s24] ss:$0 sm:$0xff]  ;;  %s2587_s24 = sld [smem:[#allocation23_spill]] }
 0x577   : > { %1794 = vrcp.f32 %v1060_v31 }
 0x579   : > { %v949_v37 = vpop.permute.xlu1 %948 }
 0x57a   : > { %v954_v38 = vsel %vm724_vm3, %v949_v37, 0 }
 0x57b   : > { %1620 = vmatpush3.bf16.msra.mxu0 %v954_v38 }
 0x57c   : > { %1631 = vmatprep.subr.bf16.mxu0 %v2021_v8  ;;  %s2494_s0 = scalar_lea.hbm %s2587_s24, %s1548_s21 }
 0x57d   : > { %v1065_v41 = vpop.permute.xlu1 %1064 }
 0x57e   : > { %v1070_v44 = vsel %vm724_vm3, %v1065_v41, 0 }
 0x580   : > { %v1793_v39 = vpop.eup %1792 }
 0x581   : > { %v946_v40 = vmul.f32 %v1793_v39, %v1787_v21  ;;  %v1795_v43 = vpop.eup %1794  ;;  %v1772_v21 = vld [vmem:[%s2583_s6] sm:$0xff]  }
 0x582   : > { %v1062_v45 = vmul.f32 %v1795_v43, %v1785_v16 }
 0x583   : > { %v947_v42 = vpack.c.bf16 %v946_v40, %v946_v40 }
 0x584   : > { %v1063_v46 = vpack.c.bf16 %v1062_v45, %v1062_v45 }
 0x585   : > { %1622 = vmatmul.mubr.msk.bf16.vlgmr.msra.gmra.mrb[12].mxu0 %vm660_vm2, %v947_v42 }
 0x586   : > { %1632 = vmatpush3.bf16.msra.mxu0 %v1070_v44  ;;  %1633 = vmatprep.mubr.msk.bf16.mxu0 %vm2022_vm1, %v2021_v8 }
 0x587   : > { %1645 = vmatprep.subr.bf16.mxu0 %v2021_v8 }
 0x58d   : > { %1634 = vmatmul.mubr.msk.bf16.vlgmr.msra.gmra.mrb[16].mxu0 %vm660_vm2, %v1063_v46 }
 0x58e   : > { %1649 = vmatprep.mubr.msk.bf16.mxu0 %vm2022_vm1, %v2021_v8  ;;  %1646 = vmatpush3.bf16.msra.mxu0 %v1772_v21 }
 0x58f   : > { %1647 = vmatprep.subr.bf16.mxu0 %v2021_v8 }
 0x623   : > { %v762_v47 = vpop.f32.mrb[4].mxu0 }
 0x624   : > { %768 = vst.msk [vmem:[#allocation2] sm:$0xff] %vm660_vm2, %v762_v47  ;;  %v1599_v48 = vpop.f32.mrb[5].mxu0 }
 0x625   : > { %v765_v49 = vpop.f32.mrb[6].mxu0 }
 0x626   : > { %v1600_v50 = vpop.f32.mrb[7].mxu0 }
 0x634   : > { %v874_v51 = vpop.f32.mrb[8].mxu0 }
 0x635   : > { %881 = vrot.lane.b32.xlu0 %v874_v51, %s2034_s12  ;;  %v1611_v52 = vpop.f32.mrb[9].mxu0 }
 0x636   : > { %v877_v53 = vpop.f32.mrb[10].mxu0 }
 0x637   : > { %v1612_v54 = vpop.f32.mrb[11].mxu0 }
 0x658   : > { %v990_v57 = vpop.f32.mrb[12].mxu0 }
 0x659   : > { %997 = vrot.lane.b32.xlu1 %v990_v57, %s2035_s23  ;;  %v1623_v58 = vpop.f32.mrb[13].mxu0  ;;  %s2037_s23 = smov [#allocation12]  }
 0x65a   : > { %v993_v59 = vpop.f32.mrb[14].mxu0 }
 0x65b   : > { %v1624_v60 = vpop.f32.mrb[15].mxu0 }
 0x660   : > { %v1106_v61 = vpop.f32.mrb[16].mxu0 }
 0x661   : > { %1113 = vrot.lane.b32.xlu0 %v1106_v61, %s2036_s14  ;;  %v1635_v62 = vpop.f32.mrb[17].mxu0  ;;  %s1944_s14 = sshll.u32 %s2037_s23, 4  ;;  %s1945_s14 = int_to_ptr.vmem [resolvable:$false] %s1944_s14 }
 0x662   : > { %v1109_v63 = vpop.f32.mrb[18].mxu0  ;;  %p1947_p3 = scmp.lt.s32.totalorder %s2496_s10, %s1945_s14 }
 0x663   : > { %v1636_v1 = vpop.f32.mrb[19].mxu0 }
 0x6a7   : > { %v882_v2 = vpop.permute.xlu0 %881 }
 0x6a8   : > { %885 = vst.msk [vmem:[#allocation2] sm:$0xff] %vm884_vm4, %v882_v2 }
 0x6cb   : > { %v998_v3 = vpop.permute.xlu1 %997 }
 0x6cc   : > { %1001 = vst.msk [vmem:[#allocation2] sm:$0xff] %vm1000_vm5, %v998_v3 }
 0x6d3   : > { %v1114_v4 = vpop.permute.xlu0 %1113 }
 0x6d4   : > { %1117 = vst.msk [vmem:[#allocation2] sm:$0xff] %vm1116_vm6, %v1114_v4 }
 0x6db   : > { %v1118_v5 = vld [vmem:[#allocation2] sm:$0xff] }
 0x6dc   : > { %v1119_v6 = vpack.c.bf16 %v1118_v5, %v1118_v5 }
 0x6de   : > { %1642 = vmatmul.mubr.msk.bf16.vlgmr.msra.gmra.mrb[16].mxu1 %vm552_vm0, %v1119_v6 }
 0x6df   : > { %1661 = vmatprep.mubr.msk.bf16.mxu1 %vm2022_vm1, %v2021_v8  ;;  %1654 = vmatpush3.bf16.msra.mxu1 %v1774_v22 }
 0x6e0   : > { %1655 = vmatprep.subr.bf16.mxu1 %v2021_v8 }
 0x6e3   : > { %1656 = vmatpush3.bf16.msra.mxu1 %v1775_v23 }
 0x6e4   : > { %1657 = vmatprep.subr.bf16.mxu1 %v2021_v8 }
 0x6e7   : > { %1658 = vmatpush3.bf16.msra.mxu1 %v1776_v34 }
 0x6e8   : > { %1659 = vmatprep.subr.bf16.mxu1 %v2021_v8  ;;  %v1541_v8 = vld [vmem:[%s2586_s26] ss:$0 sm:$0xff]  ;;  %s1946_s26 = scalar_lea.vmem %s1945_s14, 256 }
 0x6e9   : > { %p1948_p13 = scmp.lt.s32.totalorder %s1946_s26, %s1940_s11 }
 0x6eb   : > { %1660 = vmatpush3.bf16.msra.mxu1 %v1777_v35  ;;  %p1949_p0 = por %p1948_p13, %p1947_p3 }
 0x6ed   : > { %p1950_p2 = pnand %p1949_p0, %p1943_p4 }
 0x7b1   : > { %v1180_v9 = vpop.f32.mrb[16].mxu1 }
 0x7b2   : > { %v1181_v10 = vadd.f32 %v1531_v7, %v1180_v9  ;;  %v1643_v11 = vpop.f32.mrb[17].mxu1 }
 0x7b3   : > { %v1183_v12 = vpop.f32.mrb[18].mxu1 }
 0x7b4   : > { %v1186_v13 = vadd.f32 %v1181_v10, %v2356_v0  ;;  %v1644_v14 = vpop.f32.mrb[19].mxu1  ;;  %v1773_v0 = vld [vmem:[%s2583_s6 + $0x8] sm:$0xff]  }
 0x7b5   : > { %1648 = vmatpush3.bf16.msra.mxu0 %v1773_v0 }
 0x7b6   : > { %v1189_v15 = vsel %vm552_vm0, %v1186_v13, 0.0 }
 0x7b7   : > { %1190 = vadd.xlane.f32.xlu1 %v1189_v15 }
 0x844   : > { %v1191_v16 = vpop.xlane.xlu1 %1190 }
 0x845   : > { %v1192_v17 = vmul.f32 0.03125, %v1191_v16 }
 0x847   : > { %v1193_v18 = vsub.f32 %v1186_v13, %v1192_v17 }
 0x849   : > { %v1194_v19 = vmul.f32 %v1193_v18, %v1193_v18 }
 0x84b   : > { %v1195_v20 = vsel %vm552_vm0, %v1194_v19, 0.0 }
 0x84c   : > { %1196 = vadd.xlane.f32.xlu0 %v1195_v20 }
 0x8d9   : > { %v1197_v24 = vpop.xlane.xlu0 %1196 }
 0x8da   : > { %v1198_v25 = vmul.f32 0.03125, %v1197_v24 }
 0x8dc   : > { %v1199_v27 = vadd.f32 1e-05, %v1198_v25 }
 0x8de   : > { %1796 = vrsqrt.f32 %v1199_v27 }
 0x8e8   : > { %v1797_v28 = vpop.eup %1796 }
 0x8e9   : > { %v1201_v30 = vmul.f32 %v1797_v28, %v1193_v18 }
 0x8eb   : > { %v1208_v31 = vmul.f32 %v1535_v29, %v1201_v30 }
 0x8ed   : > { %v1215_v32 = vadd.f32 %v1536_v26, %v1208_v31 }
 0x8ef   : > { %v1216_v33 = vpack.c.bf16 %v1215_v32, %v1215_v32 }
 0x8f1   : > { %1650 = vmatmul.mubr.msk.bf16.vlgmr.msra.gmra.mrb[20].mxu0 %vm552_vm0, %v1216_v33 }
 0x9c4   : > { %v1277_v37 = vpop.f32.mrb[20].mxu0 }
 0x9c5   : > { %v1278_v38 = vadd.f32 %v1537_v36, %v1277_v37  ;;  %v1651_v39 = vpop.f32.mrb[21].mxu0 }
 0x9c6   : > { %v1280_v40 = vpop.f32.mrb[22].mxu0 }
 0x9c7   : > { %v1283_v41 = vmax.f32 %v1278_v38, 0.0  ;;  %v1652_v42 = vpop.f32.mrb[23].mxu0 }
 0x9c9   : > { %v1284_v43 = vpack.c.bf16 %v1283_v41, %v1283_v41 }
 0x9cb   : > { %1662 = vmatmul.mubr.msk.bf16.vlgmr.msra.gmra.mrb[20].mxu1 %vm1324_vm7, %v1284_v43 }
 0xa9e   : > { %v1362_v44 = vpop.f32.mrb[20].mxu1 }
 0xa9f   : > { %v1363_v45 = vadd.f32 %v1541_v8, %v1362_v44  ;;  %v1663_v46 = vpop.f32.mrb[21].mxu1 }
 0xaa0   : > { %v1365_v47 = vpop.f32.mrb[22].mxu1 }
 0xaa1   : > { %v1368_v48 = vadd.f32 %v1363_v45, %v1186_v13  ;;  %v1664_v49 = vpop.f32.mrb[23].mxu1 }
 0xaa3   : > { %1369 = vst.msk [vmem:[%s542_s18] sm:$0xff] %vm552_vm0, %v1368_v48 }
 0xaa4   : > { %1953 = shalt.err (!%p1950_p2)
}
 0xaa5   : > { %s1954_s22 = scalar_lea.hbm %s2494_s0, 128  ;;  %s1958_s12 = scalar_lea.hbm %s2587_s24, 256 }
 0xaa6   : > { %p1955_p8 = scmp.ne.s32.totalorder %s2494_s0, %s1954_s22  ;;  %p1959_p12 = scmp.lt.u32.totalorder %s2494_s0, %s2587_s24 }
 0xaa7   : > { %p1960_p1 = scmp.lt.u32.totalorder %s1958_s12, %s1954_s22  ;;  %p1962_p6 = scmp.lt.u32.totalorder %s1954_s22, %s2494_s0 }
 0xaa8   : > { %p1956_p10 = pnand %p1955_p8, %p2588_p7 }
 0xaa9   : > { %p1961_p5 = por %p1960_p1, %p1959_p12 }
 0xaaa   : > { %p1957_p11 = pneg %p1956_p10 }
 0xaab   : > { %p1963_p9 = por %p1962_p6, %p1961_p5 }
 0xaad   : > { %p1964_p4 = pnand %p1963_p9, %p1957_p11 }
 0xaaf   : > { %1967 = shalt.err (!%p1964_p4)
}
 0xab0   : > { %1683 = dma.vmem_to_hbm [thread:$0]  (%p2588_p7), %s2496_s10, 128, %s2494_s0, %s1371_s19  }
 0xab1 PF: > { %s1396_s11 = sand.u32 1, %s2002_s29   ;;  %p2589_p3 = scmp.ne.s32.totalorder %s2575_s28, 0 }
 0xab2   : > { %p2590_p13 = scmp.ge.s32.totalorder %s2014_s16, 2  ;;  %s1397_s14 = scalar_lea.sflag [#allocation5], %s1396_s11 }
 0xab4   : > { %p1703_p0 = pnand %p2590_p13, %p2589_p3 }
 0xab6   : > { %1997 = dma.done.wait (!%p1703_p0), %s1397_s14, 128  }
 0xab7   : > { %1999 = vsyncadd (!%p1703_p0), %s1397_s14, 4294967168  ;;  %p29_p2 = scmp.ge.s32.totalorder %s2259_s25, 4   ;;  %s2591_s29 = smov %s2006_s30 }
 0xab8   : > { %s2592_s30 = smov %s2010_s15  ;;  %s2593_s15 = smov %s2270_s17 }
 0xab9   : > { %s2594_s16 = smov %s2259_s25  ;;  %31 = sbr.rel (!%p29_p2) target bundleno = 15 (0xf), region = 140 }
 0xac0   :  { %1402 = vsyncpa [#allocation4], 1 }
 0xac1   :  { %1404 = vsyncpa [#allocation4 + $0x1], 1 }
 0xac2   :  { %1405 = vsyncpa [#allocation7], 1 }
 0xac3   :  { %1406 = vsyncpa [#allocation10], 1 }
 0xac4   :  { %1407 = vsyncpa [#allocation5], 1 }
 0xac5   :  { %1409 = vsyncpa [#allocation5 + $0x1], 1 }

</bundles_post_ra>
